<compile_context>
chip_gen: v5e
topology: v5e:2x2
jax: 0.10.0
libtpu: 0.0.40
codegen_flags: <defaults>
</compile_context>

<pallas_src>
import functools

import jax
import jax.numpy as jnp
import numpy as np
from jax.experimental import pallas as pl
from jax.experimental.pallas import tpu as pltpu


def _round_up(v, m):
    return ((v + m - 1) // m) * m


def _vmem_bytes_physical():
    """Physical per-core VMEM (fallback: 64 MiB, the smallest of v5e/v6e/v7x)."""
    try:
        info = pltpu.get_tpu_info()
        cap = getattr(info, "vmem_capacity_bytes", None)
        if cap:
            return int(cap)
    except Exception:
        pass
    return 64 * 1024 * 1024


def _auto_lane_tile(C, x_itemsize, M, vmem_limit):
    """Largest 128-multiple lane tile whose accounted VMEM footprint fits."""
    sub = 8 * max(1, 4 // int(x_itemsize))        # sublane tile: f32->8, bf16->16, 8bit->32
    c_pad = _round_up(max(int(C), 1), sub)
    per_lane = (
        2 * c_pad * int(x_itemsize)   # logits block, double-buffered
        + 2 * 8 * 4                   # (1,thw) target block (8-sublane padded), double-buffered
        + 2 * 2 * 8 * 4               # two (1,thw) f32 accumulator outputs, double-buffered
        + 4 * c_pad * 4               # live (C,thw) f32 intermediates (upcast/exp/masked + slack)
        + 12 * 8 * 4                  # live (1,thw) f32 intermediates (8-sublane padded)
    )
    budget = int(vmem_limit * 0.6)    # leave headroom for Mosaic internal scratch
    thw = (budget // per_lane) // 128 * 128
    return max(128, min(thw, _round_up(M, 128)))


def _focal_kernel(x_ref, t_ref, alpha_ref, f_out_ref, a_out_ref,
                  *, gamma: float, smooth, valid_len: int, thw: int):
    """One grid step processes a (C, thw) tile: C classes x thw spatial lanes."""
    ji = pl.program_id(2)

    @pl.when(ji == 0)
    def _():
        f_out_ref[...] = jnp.zeros_like(f_out_ref)
        a_out_ref[...] = jnp.zeros_like(a_out_ref)

    x = x_ref[...].astype(jnp.float32)            # (C, thw)  classes on sublanes
    t = t_ref[...]                                # (1, thw)  target per lane
    if t.dtype != jnp.int32:
        t = t.astype(jnp.int32)
    C = x.shape[0]

    # Softmax at the target class with a single exp pass:
    #   e = exp(x - m); s = sum(e); p_t = e[t] / s   (no exp(logp)/log(s) pair)
    m = jnp.max(x, axis=0, keepdims=True)                          # (1, thw)
    e = jnp.exp(x - m)                                             # (C, thw)  EUP
    s = jnp.sum(e, axis=0, keepdims=True)                          # (1, thw)

    cls = jax.lax.broadcasted_iota(jnp.int32, (C, thw), 0)
    one_hot = cls == t                                             # (C, thw) bool
    e_t = jnp.sum(jnp.where(one_hot, e, 0.0), axis=0, keepdims=True)
    p_t = e_t / s           # exact divide (approx reciprocal breaks 1e-5 tolerance)

    eps = jnp.float32(1e-10)
    if smooth:
        # clip(one_hot, s, 1-s) dot softmax  ==  s + (1-2s) * p_t
        sm = jnp.float32(smooth)
        pt = sm + (jnp.float32(1.0) - jnp.float32(2.0) * sm) * p_t + eps
    else:
        pt = p_t + eps
    logpt = jnp.log(pt)

    omp = 1.0 - pt
    g = float(gamma)
    if g == 2.0:                      # default: avoid pow (2 EUP transcendentals)
        powt = omp * omp
    elif g == 1.0:
        powt = omp
    elif g == 0.0:
        powt = jnp.ones_like(omp)
    else:
        powt = jnp.power(omp, jnp.float32(g))
    f = -powt * logpt                                              # (1, thw)

    # alpha[target] via the *un-smoothed* one-hot (matches alpha[idx] in torch).
    a = jnp.sum(jnp.where(one_hot, alpha_ref[...].astype(jnp.float32), 0.0),
                axis=0, keepdims=True)                             # (1, thw)

    # Always-on lane mask: handles the ragged last tile and any duplicated
    # (clamped) dummy tile.  jnp.where (not multiply) so NaN/Inf coming from
    # uninitialized out-of-bounds lanes never poisons the accumulators.
    blk = pl.program_id(1) * pl.num_programs(2) + ji
    col = blk * thw + jax.lax.broadcasted_iota(jnp.int32, (1, thw), 1)
    valid = col < valid_len
    f_out_ref[...] += jnp.where(valid, f, 0.0)
    a_out_ref[...] += jnp.where(valid, a, 0.0)


def multi_focal_loss(x, target, alpha, *, gamma=2.0, smooth=None,
                     size_average=True, tile=None):
    """JAX/Pallas equivalent of MultiFocalLoss.forward.

    x:      [B, C, H, W] (or [B, C]) float logits, NCHW like the PyTorch module
    target: [B, H, W]    (or [B])    integer class indices
    alpha:  [C]                      per-class scalar factors (the module's
                                     self.alpha, already built / normalized)
    tile:   optional lane-tile override; default auto-sizes from VMEM.
    """
    C = x.shape[1]
    if x.ndim > 2:
        Bg = x.shape[0]
        xr = x.reshape(Bg, C, -1)                     # NCHW -> (B, C, HW), no transpose
        tr = target.reshape(Bg, 1, -1)                # (B, 1, HW)
    else:
        Bg = 1
        xr = jnp.transpose(x, (1, 0))[None, :, :]     # (B, C) -> (1, C, B)
        tr = target.reshape(1, 1, -1)
    # Keep a narrow integer target stream if it comes from upstream; otherwise int32.
    if not jnp.issubdtype(tr.dtype, jnp.integer):
        tr = tr.astype(jnp.int32)

    _, _, M = xr.shape
    N = Bg * M                                        # number of "rows" in torch's view

    item_x = jnp.dtype(x.dtype).itemsize
    item_t = jnp.dtype(tr.dtype).itemsize

    # Generation-aware VMEM budget: ~75% of physical, capped at 96 MiB
    # (v5e/v6e: 96 of 128 MiB; v7x: 48 of 64 MiB).
    vmem_limit = min(_vmem_bytes_physical() * 3 // 4, 96 * 1024 * 1024)

    if tile is None:
        thw = _auto_lane_tile(C, item_x, M, vmem_limit)
    else:
        thw = max(128, min(_round_up(int(tile), 128), _round_up(M, 128)))

    n_blocks = pl.cdiv(M, thw)
    # Spatial "parallel" split so both v7x TensorCores get work even at B=1.
    n_outer = 2 if n_blocks >= 2 else 1
    n_inner = pl.cdiv(n_blocks, n_outer)
    BO = Bg * n_outer

    alpha2d = jnp.asarray(alpha, jnp.float32).reshape(C, 1)

    grid = (Bg, n_outer, n_inner)
    kernel = functools.partial(_focal_kernel, gamma=float(gamma), smooth=smooth,
                               valid_len=int(M), thw=int(thw))

    def _in_map(b, jo, ji):
        # Clamp so a dummy trailing iteration (n_outer*n_inner > n_blocks) never
        # addresses a fully out-of-bounds block; its lanes are masked in-kernel.
        blk = jnp.minimum(jo * n_inner + ji, n_blocks - 1)
        return (b, 0, blk)

    def _out_map(b, jo, ji):
        return (b * n_outer + jo, 0, 0)               # resident across ji (arbitrary axis)

    cost = pl.CostEstimate(
        flops=int(Bg) * int(M) * (8 * C + 16),
        transcendentals=int(Bg) * int(M) * (C + 2),
        bytes_accessed=int(Bg) * int(M) * (C * item_x + item_t)
                       + 2 * BO * thw * 4 + C * 4)

    sum_f, sum_a = pl.pallas_call(
        kernel,
        out_shape=(jax.ShapeDtypeStruct((BO, 1, thw), jnp.float32),
                   jax.ShapeDtypeStruct((BO, 1, thw), jnp.float32)),
        grid_spec=pltpu.PrefetchScalarGridSpec(
            num_scalar_prefetch=0,
            grid=grid,
            in_specs=[
                pl.BlockSpec((None, C, thw), _in_map),          # logits (orig dtype)
                pl.BlockSpec((None, 1, thw), _in_map),          # targets
                pl.BlockSpec((C, 1), lambda b, jo, ji: (0, 0)),  # alpha (replicated)
            ],
            out_specs=[
                pl.BlockSpec((None, 1, thw), _out_map),         # per-(b,jo) focal partials
                pl.BlockSpec((None, 1, thw), _out_map),         # per-(b,jo) alpha partials
            ],
        ),
        compiler_params=pltpu.CompilerParams(
            dimension_semantics=("parallel", "parallel", "arbitrary"),
            vmem_limit_bytes=int(vmem_limit)),
        cost_estimate=cost,
    )(xr, tr, alpha2d)

    total = jnp.sum(sum_a) * jnp.sum(sum_f)
    if size_average:
        return total / jnp.float32(N * N)
    return total


def _reference_jax(x, target, alpha, gamma=2.0, smooth=None, size_average=True):
    """Pure-JAX mirror of the PyTorch forward (including the broadcast quirk)."""
    C = x.shape[1]
    p = jax.nn.softmax(x.astype(jnp.float32), axis=1)
    if p.ndim > 2:
        p = p.reshape(x.shape[0], C, -1)
        p = jnp.transpose(p, (0, 2, 1)).reshape(-1, C)
    t = target.reshape(-1).astype(jnp.int32)
    one_hot = jax.nn.one_hot(t, C, dtype=jnp.float32)
    if smooth:
        one_hot = jnp.clip(one_hot, smooth, 1.0 - smooth)
    pt = jnp.sum(one_hot * p, axis=1) + 1e-10
    logpt = jnp.log(pt)
    a = jnp.asarray(alpha, jnp.float32).reshape(-1)[t]              # (N,), un-smoothed gather
    loss = (-1.0 * a)[:, None, None] * (jnp.power(1.0 - pt, gamma) * logpt)  # (N,1,N)
    return jnp.mean(loss) if size_average else jnp.sum(loss)


if __name__ == "__main__":
    key = jax.random.PRNGKey(0)
    kx, kt, kx2, kt2 = jax.random.split(key, 4)

    # --- Test 1: module defaults (alpha=None -> ones, gamma=2, smooth=None, mean) ---
    B, C, H, W = 2, 4, 16, 16
    x = jax.random.normal(kx, (B, C, H, W), dtype=jnp.float32)
    target = jax.random.randint(kt, (B, H, W), 0, C, dtype=jnp.int32)
    alpha = jnp.ones((C,), jnp.float32)          # __init__ with alpha=None

    loss = jax.block_until_ready(
        multi_focal_loss(x, target, alpha, gamma=2.0, smooth=None, size_average=True))
    ref = jax.block_until_ready(
        _reference_jax(x, target, alpha, gamma=2.0, smooth=None, size_average=True))
    np.testing.assert_allclose(np.asarray(loss), np.asarray(ref), rtol=1e-5, atol=1e-5)

    # --- Test 2: non-128-multiple spatial (ragged / masked edge-block path),
    #             label smoothing, list-style normalized alpha, sum reduction ---
    B2, C2, H2, W2 = 2, 4, 10, 10
    x2 = jax.random.normal(kx2, (B2, C2, H2, W2), dtype=jnp.float32)
    t2 = jax.random.randint(kt2, (B2, H2, W2), 0, C2, dtype=jnp.int32)
    a_list = np.array([1.0, 2.0, 0.5, 1.5], np.float32)
    alpha2 = jnp.asarray(a_list / a_list.sum())  # __init__ list path normalization

    loss2 = jax.block_until_ready(
        multi_focal_loss(x2, t2, alpha2, gamma=2.0, smooth=0.1, size_average=False))
    ref2 = jax.block_until_ready(
        _reference_jax(x2, t2, alpha2, gamma=2.0, smooth=0.1, size_average=False))
    np.testing.assert_allclose(np.asarray(loss2), np.asarray(ref2), rtol=3e-5, atol=1e-4)

    print("KERNEL_OK")
</pallas_src>

<mosaic_0001>
module attributes {stable_mosaic.version = 11 : i64} {
  func.func @_focal_kernel(%arg0: i32, %arg1: i32, %arg2: i32, %arg3: memref<1x4x256xf32, #tpu.memory_space<vmem>>, %arg4: memref<1x1x256xi32, #tpu.memory_space<vmem>>, %arg5: memref<4x1xf32, #tpu.memory_space<vmem>>, %arg6: memref<1x1x256xf32, #tpu.memory_space<vmem>>, %arg7: memref<1x1x256xf32, #tpu.memory_space<vmem>>) attributes {dimension_semantics = [#tpu.dimension_semantics<parallel>, #tpu.dimension_semantics<parallel>, #tpu.dimension_semantics<arbitrary>], iteration_bounds = array<i64: 2, 1, 1>, scalar_prefetch = 0 : i64, scratch_operands = 0 : i64, tpu.core_type = #tpu.core_type<tc>, window_params = [{transform_indices = @transform_0, window_bounds = array<i64: 1, 4, 256>}, {transform_indices = @transform_1, window_bounds = array<i64: 1, 1, 256>}, {pipeline_mode = #tpu.pipeline_mode<synchronous>, transform_indices = @transform_2, window_bounds = array<i64: 4, 1>}, {transform_indices = @transform_3, window_bounds = array<i64: 1, 1, 256>}, {transform_indices = @transform_4, window_bounds = array<i64: 1, 1, 256>}]} {
    %c0_i32 = arith.constant 0 : i32
    %0 = arith.cmpi eq, %arg2, %c0_i32 : i32
    %1 = arith.extui %0 : i1 to i32
    %c0_i32_0 = arith.constant 0 : i32
    %2 = arith.cmpi ne, %1, %c0_i32_0 : i32
    scf.if %2 {
      %cst_31 = arith.constant 0.000000e+00 : f32
      %62 = vector.broadcast %cst_31 : f32 to vector<1x256xf32>
      %c0_32 = arith.constant 0 : index
      %c0_33 = arith.constant 0 : index
      %c0_34 = arith.constant 0 : index
      %63 = vector.load %arg6[%c0_32, %c0_33, %c0_34] : memref<1x1x256xf32, #tpu.memory_space<vmem>>, vector<1x1x256xf32>
      %64 = vector.shape_cast %63 : vector<1x1x256xf32> to vector<1x256xf32>
      %65 = vector.shape_cast %62 : vector<1x256xf32> to vector<1x1x256xf32>
      tpu.vector_store %arg6[%c0_32, %c0_33, %c0_34], %65 {strides = array<i32>} : memref<1x1x256xf32, #tpu.memory_space<vmem>>, vector<1x1x256xf32>,
      %cst_35 = arith.constant 0.000000e+00 : f32
      %66 = vector.broadcast %cst_35 : f32 to vector<1x256xf32>
      %c0_36 = arith.constant 0 : index
      %c0_37 = arith.constant 0 : index
      %c0_38 = arith.constant 0 : index
      %67 = vector.load %arg7[%c0_36, %c0_37, %c0_38] : memref<1x1x256xf32, #tpu.memory_space<vmem>>, vector<1x1x256xf32>
      %68 = vector.shape_cast %67 : vector<1x1x256xf32> to vector<1x256xf32>
      %69 = vector.shape_cast %66 : vector<1x256xf32> to vector<1x1x256xf32>
      tpu.vector_store %arg7[%c0_36, %c0_37, %c0_38], %69 {strides = array<i32>} : memref<1x1x256xf32, #tpu.memory_space<vmem>>, vector<1x1x256xf32>,
    } else {
    }
    %c0 = arith.constant 0 : index
    %c0_1 = arith.constant 0 : index
    %c0_2 = arith.constant 0 : index
    %3 = vector.load %arg3[%c0, %c0_1, %c0_2] : memref<1x4x256xf32, #tpu.memory_space<vmem>>, vector<1x4x256xf32>
    %4 = vector.shape_cast %3 : vector<1x4x256xf32> to vector<4x256xf32>
    %c0_3 = arith.constant 0 : index
    %c0_4 = arith.constant 0 : index
    %c0_5 = arith.constant 0 : index
    %5 = vector.load %arg4[%c0_3, %c0_4, %c0_5] : memref<1x1x256xi32, #tpu.memory_space<vmem>>, vector<1x1x256xi32>
    %6 = vector.shape_cast %5 : vector<1x1x256xi32> to vector<1x256xi32>
    %cst = arith.constant dense<0xFF800000> : vector<256xf32>
    %7 = vector.multi_reduction <maximumf>, %4, %cst [0] : vector<4x256xf32> to vector<256xf32>
    %8 = vector.shape_cast %7 : vector<256xf32> to vector<1x256xf32>
    %9 = vector.broadcast %8 : vector<1x256xf32> to vector<4x256xf32>
    %10 = arith.subf %4, %9 : vector<4x256xf32>
    %11 = math.exp %10 : vector<4x256xf32>
    %cst_6 = arith.constant dense<0.000000e+00> : vector<256xf32>
    %12 = vector.multi_reduction <add>, %11, %cst_6 [0] : vector<4x256xf32> to vector<256xf32>
    %13 = vector.shape_cast %12 : vector<256xf32> to vector<1x256xf32>
    %14 = tpu.iota {dimensions = array<i32: 0>} : vector<4x256xi32>
    %15 = vector.broadcast %6 : vector<1x256xi32> to vector<4x256xi32>
    %16 = arith.cmpi eq, %14, %15 : vector<4x256xi32>
    %cst_7 = arith.constant 0.000000e+00 : f32
    %17 = vector.broadcast %cst_7 : f32 to vector<4x256xf32>
    %18 = arith.select %16, %11, %17 : vector<4x256xi1>, vector<4x256xf32>
    %cst_8 = arith.constant dense<0.000000e+00> : vector<256xf32>
    %19 = vector.multi_reduction <add>, %18, %cst_8 [0] : vector<4x256xf32> to vector<256xf32>
    %20 = vector.shape_cast %19 : vector<256xf32> to vector<1x256xf32>
    %21 = arith.divf %20, %13 : vector<1x256xf32>
    %cst_9 = arith.constant 1.000000e-10 : f32
    %22 = vector.broadcast %cst_9 : f32 to vector<1x256xf32>
    %23 = arith.addf %21, %22 : vector<1x256xf32>
    %24 = math.log %23 : vector<1x256xf32>
    %cst_10 = arith.constant 1.000000e+00 : f32
    %25 = vector.broadcast %cst_10 : f32 to vector<1x256xf32>
    %26 = arith.subf %25, %23 : vector<1x256xf32>
    %27 = arith.mulf %26, %26 : vector<1x256xf32>
    %cst_11 = arith.constant 0.000000e+00 : f32
    %28 = vector.broadcast %cst_11 : f32 to vector<1x256xf32>
    %29 = arith.subf %28, %27 : vector<1x256xf32>
    %30 = arith.mulf %29, %24 : vector<1x256xf32>
    %c0_12 = arith.constant 0 : index
    %c0_13 = arith.constant 0 : index
    %31 = vector.load %arg5[%c0_12, %c0_13] : memref<4x1xf32, #tpu.memory_space<vmem>>, vector<4x1xf32>
    %cst_14 = arith.constant 0.000000e+00 : f32
    %32 = vector.shape_cast %31 : vector<4x1xf32> to vector<4x1xf32>
    %33 = vector.broadcast %32 : vector<4x1xf32> to vector<4x256xf32>
    %34 = vector.broadcast %cst_14 : f32 to vector<4x256xf32>
    %35 = arith.select %16, %33, %34 : vector<4x256xi1>, vector<4x256xf32>
    %cst_15 = arith.constant dense<0.000000e+00> : vector<256xf32>
    %36 = vector.multi_reduction <add>, %35, %cst_15 [0] : vector<4x256xf32> to vector<256xf32>
    %37 = vector.shape_cast %36 : vector<256xf32> to vector<1x256xf32>
    %c1_i32 = arith.constant 1 : i32
    %38 = arith.muli %arg1, %c1_i32 : i32
    %39 = arith.addi %38, %arg2 : i32
    %c256_i32 = arith.constant 256 : i32
    %40 = arith.muli %39, %c256_i32 : i32
    %41 = tpu.iota {dimensions = array<i32: 1>} : vector<1x256xi32>
    %42 = vector.broadcast %40 : i32 to vector<1x256xi32>
    %43 = arith.addi %42, %41 : vector<1x256xi32>
    %c256_i32_16 = arith.constant 256 : i32
    %44 = vector.broadcast %c256_i32_16 : i32 to vector<1x256xi32>
    %45 = arith.cmpi slt, %43, %44 : vector<1x256xi32>
    %c0_17 = arith.constant 0 : index
    %c0_18 = arith.constant 0 : index
    %c0_19 = arith.constant 0 : index
    %46 = vector.load %arg6[%c0_17, %c0_18, %c0_19] : memref<1x1x256xf32, #tpu.memory_space<vmem>>, vector<1x1x256xf32>
    %47 = vector.shape_cast %46 : vector<1x1x256xf32> to vector<1x256xf32>
    %cst_20 = arith.constant 0.000000e+00 : f32
    %48 = vector.broadcast %cst_20 : f32 to vector<1x256xf32>
    %49 = arith.select %45, %30, %48 : vector<1x256xi1>, vector<1x256xf32>
    %50 = arith.addf %47, %49 : vector<1x256xf32>
    %c0_21 = arith.constant 0 : index
    %c0_22 = arith.constant 0 : index
    %c0_23 = arith.constant 0 : index
    %51 = vector.load %arg6[%c0_21, %c0_22, %c0_23] : memref<1x1x256xf32, #tpu.memory_space<vmem>>, vector<1x1x256xf32>
    %52 = vector.shape_cast %51 : vector<1x1x256xf32> to vector<1x256xf32>
    %53 = vector.shape_cast %50 : vector<1x256xf32> to vector<1x1x256xf32>
    tpu.vector_store %arg6[%c0_21, %c0_22, %c0_23], %53 {strides = array<i32>} : memref<1x1x256xf32, #tpu.memory_space<vmem>>, vector<1x1x256xf32>,
    %c0_24 = arith.constant 0 : index
    %c0_25 = arith.constant 0 : index
    %c0_26 = arith.constant 0 : index
    %54 = vector.load %arg7[%c0_24, %c0_25, %c0_26] : memref<1x1x256xf32, #tpu.memory_space<vmem>>, vector<1x1x256xf32>
    %55 = vector.shape_cast %54 : vector<1x1x256xf32> to vector<1x256xf32>
    %cst_27 = arith.constant 0.000000e+00 : f32
    %56 = vector.broadcast %cst_27 : f32 to vector<1x256xf32>
    %57 = arith.select %45, %37, %56 : vector<1x256xi1>, vector<1x256xf32>
    %58 = arith.addf %55, %57 : vector<1x256xf32>
    %c0_28 = arith.constant 0 : index
    %c0_29 = arith.constant 0 : index
    %c0_30 = arith.constant 0 : index
    %59 = vector.load %arg7[%c0_28, %c0_29, %c0_30] : memref<1x1x256xf32, #tpu.memory_space<vmem>>, vector<1x1x256xf32>
    %60 = vector.shape_cast %59 : vector<1x1x256xf32> to vector<1x256xf32>
    %61 = vector.shape_cast %58 : vector<1x256xf32> to vector<1x1x256xf32>
    tpu.vector_store %arg7[%c0_28, %c0_29, %c0_30], %61 {strides = array<i32>} : memref<1x1x256xf32, #tpu.memory_space<vmem>>, vector<1x1x256xf32>,
    return
  }
  func.func @transform_0(%arg0: i32, %arg1: i32, %arg2: i32) -> (i32, i32, i32) {
    %c1_i32 = arith.constant 1 : i32
    %0 = arith.muli %arg1, %c1_i32 : i32
    %1 = arith.addi %0, %arg2 : i32
    %c0_i32 = arith.constant 0 : i32
    %2 = arith.minsi %1, %c0_i32 : i32
    %c0_i32_0 = arith.constant 0 : i32
    %c0_i32_1 = arith.constant 0 : i32
    return %arg0, %c0_i32_0, %2 : i32, i32, i32
  }
  func.func @transform_1(%arg0: i32, %arg1: i32, %arg2: i32) -> (i32, i32, i32) {
    %c1_i32 = arith.constant 1 : i32
    %0 = arith.muli %arg1, %c1_i32 : i32
    %1 = arith.addi %0, %arg2 : i32
    %c0_i32 = arith.constant 0 : i32
    %2 = arith.minsi %1, %c0_i32 : i32
    %c0_i32_0 = arith.constant 0 : i32
    %c0_i32_1 = arith.constant 0 : i32
    return %arg0, %c0_i32_0, %2 : i32, i32, i32
  }
  func.func @transform_2(%arg0: i32, %arg1: i32, %arg2: i32) -> (i32, i32) {
    %c0_i32 = arith.constant 0 : i32
    %c0_i32_0 = arith.constant 0 : i32
    %c0_i32_1 = arith.constant 0 : i32
    return %c0_i32, %c0_i32_0 : i32, i32
  }
  func.func @transform_3(%arg0: i32, %arg1: i32, %arg2: i32) -> (i32, i32, i32) {
    %c1_i32 = arith.constant 1 : i32
    %0 = arith.muli %arg0, %c1_i32 : i32
    %1 = arith.addi %0, %arg1 : i32
    %c0_i32 = arith.constant 0 : i32
    %c0_i32_0 = arith.constant 0 : i32
    %c0_i32_1 = arith.constant 0 : i32
    return %1, %c0_i32, %c0_i32_0 : i32, i32, i32
  }
  func.func @transform_4(%arg0: i32, %arg1: i32, %arg2: i32) -> (i32, i32, i32) {
    %c1_i32 = arith.constant 1 : i32
    %0 = arith.muli %arg0, %c1_i32 : i32
    %1 = arith.addi %0, %arg1 : i32
    %c0_i32 = arith.constant 0 : i32
    %c0_i32_0 = arith.constant 0 : i32
    %c0_i32_1 = arith.constant 0 : i32
    return %1, %c0_i32, %c0_i32_0 : i32, i32, i32
  }
}

</mosaic_0001>

<bundles_post_ra>
// kernel: tpu_custom_call.1
= control target key start
LH: loop header
LB: loop body
LE: loop exit
PB: predicated region body
PF: predicated region fallthrough
CT: control target
= control target key end

     0   :  { %10 = vsyncpa [#allocation3], 0  ;;  %s1149_s0 = inlined_call_operand.hbm [shape: f32[2,4,256], index: 0, kind: input, shape index: {}]   ;;  %s1150_s1 = inlined_call_operand.vmem [shape: s32[2,1,256], index: 1, kind: input, shape index: {}]   ;;  %s1151_s2 = inlined_call_operand.vmem [shape: f32[4,1], index: 2, kind: input, shape index: {}]   ;;  %s1152_s3 = inlined_call_operand.hbm [shape: f32[2,1,256], index: 3, kind: output, shape index: {0}]   ;;  %s1153_s4 = inlined_call_operand.hbm [shape: f32[2,1,256], index: 4, kind: output, shape index: {1}]  }
   0x1   :  { %12 = vsyncpa [#allocation3 + $0x1], 0 }
   0x2   :  { %13 = vsyncpa [#allocation4], 0 }
   0x3   :  { %15 = vsyncpa [#allocation4 + $0x1], 0 }
   0x4   :  { %16 = vsyncpa [#allocation7], 0 }
   0x5   :  { %18 = vsyncpa [#allocation7 + $0x1], 0  ;;  %s955_s15 = smov 0   ;;  %s957_s16 = smov 0  }
   0x6   :  { %s959_s17 = smov 0   ;;  %s961_s18 = smov 0  }
   0x7   :  { %s963_s19 = smov 0   ;;  %s965_s20 = smov 0  }
   0x8 LB: > { %s683_s21 = sadd.s32 4294967295, %s926_s20   ;;  %s684_s22 = sadd.s32 4294967294, %s926_s20   ;;  %s926_s20 = sphi %s965_s20, %s24_s20   ;;  %s922_s19 = sphi %s963_s19, %s1168_s19   ;;  %s918_s18 = sphi %s961_s18, %s1167_s18   ;;  %s914_s17 = sphi %s959_s17, %s1166_s17   ;;  %s910_s16 = sphi %s957_s16, %s1165_s16   ;;  %s906_s15 = sphi %s955_s15, %s1164_s15  }
   0x9   : > { %s43_s23 = sadd.s32 1, %s922_s19  ;;  %s58_s24 = sadd.s32 1, %s914_s17 }
   0xa   : > { %p45_p0 = scmp.ge.s32.totalorder %s43_s23, 2  ;;  %p65_p1 = scmp.ne.s32.totalorder %s914_s17, %s910_s16 }
   0xb   : > { %p66_p2 = scmp.eq.s32.totalorder %s926_s20, 0  ;;  %p71_p3 = scmp.ne.s32.totalorder %s910_s16, %s906_s15 }
   0xc   : > { %s1170_s23 = smov (%p45_p0, %s43_s23), 0  ;;  %p72_p5 = scmp.eq.s32.totalorder %s683_s21, 0 }
   0xd   : > { %p996_p4 = por %p66_p2, %p65_p1  ;;  %s53_s26 = ssub.s32 %s922_s19, %s1170_s23 }
   0xe   : > { %p152_p6 = scmp.eq.s32.totalorder %s683_s21, 1  ;;  %p56_p7 = scmp.eq.s32.totalorder %s53_s26, 0 }
   0xf   : > { %p1002_p8 = por %p72_p5, %p71_p3  ;;  %p158_p10 = scmp.eq.s32.totalorder %s684_s22, 1 }
  0x10   : > { %p1006_p9 = por %p152_p6, %p65_p1  ;;  %p686_p12 = scmp.ge.s32.totalorder %s926_s20, 2 }
  0x11   : > { %s1011_s29 = scalar_select %p56_p7, %s914_s17, %s58_s24  }
  0x12   : > { %p1013_p11 = por %p158_p10, %p71_p3  ;;  %p719_p13 = scmp.lt.s32.totalorder %s926_s20, 2 }
  0x13   : > { %s209_s5 = sand.u32 1, %s914_s17   ;;  %s701_s7 = sshll.u32 %s922_s19, 3 }
  0x14   : > { %s687_s6 = sshll.u32 %s209_s5, 3  ;;  %s223_s10 = scalar_lea.hbm %s1149_s0, %s701_s7 }
  0x15   : > { %s213_s11 = scalar_lea.vmem [#allocation2], %s687_s6  ;;  %s225_s13 = sshll.u32 %s223_s10, 4  ;;  %s226_s13 = int_to_ptr.hbm [resolvable:$true] %s225_s13 }
  0x16   : > { %s227_s12 = sshll.u32 %s213_s11, 4  ;;  %p709_p0 = pnand %p719_p13, %p996_p4  ;;  %s228_s12 = int_to_ptr.vmem [resolvable:$true] %s227_s12 }
  0x17   : > { %p690_p1 = scmp.ge.s32.totalorder %s926_s20, 1  ;;  %p250_p2 = scmp.lt.s32.totalorder %s926_s20, 3 }
  0x18   : > { %s210_s14 = scalar_lea.sflag [#allocation3], %s209_s5 }
  0x19   : > { %711 = dma.hbm_to_vmem [thread:$0]  (!%p709_p0), %s226_s13, 128, %s228_s12, %s210_s14  }
  0x1a   : > { %p251_p3 = pnand %p690_p1, %p250_p2 }
  0x1b   : > { %s1029_s21 = sand.u32 (!%p251_p3), 1, %s910_s16  }
  0x1c   : > { %254 = sbr.rel (%p251_p3) target bundleno = 173 (0xad), region = 32  ;;  %s691_s22 = sshll.u32 (!%p251_p3), %s1029_s21, 3 }
  0x1d   : > { %s257_s24 = scalar_lea.sflag (!%p251_p3), [#allocation3], %s1029_s21  ;;  %s260_s26 = scalar_lea.vmem (!%p251_p3), [#allocation2], %s691_s22 }
  0x21   : > { %893 = dma.done.wait (%p1002_p8), %s257_s24, 128  }
  0x22   : > { %895 = vsyncadd (%p1002_p8), %s257_s24, 4294967168  ;;  %v928_v0 = vmov 0   ;;  %v455_v1 = vld [vmem:[%s1151_s2] sm:$0xf]  ;;  %v333_v2 = vld [vmem:[%s260_s26] sm:$0xff]  ;;  %vm341_vm0 = vcmask 1043456   ;;  %v327_v33 = vlaneseq }
  0x23   : > { %771 = vset.pattern.permute.xlu0 %v928_v0  ;;  %336 = vst [vmem:[#allocation1] ss:$2 sm:$0xff] %v333_v2  ;;  %p310_p4 = scmp.lt.s32.totalorder %s918_s18, 1  ;;  %s692_s10 = sshll.u32 %s1029_s21, 1  ;;  %vm493_vm12 = vcmask 1040384  }
  0x24   : > { %458 = vperm.xlu0 %771, %v455_v1   ;;  %v385_v38 = vshrl.u32 %v327_v33, 7  ;;  %vm1067_vm11 = vcmp.lt.s32.totalorder %v327_v33, 256  ;;  %s294_s11 = scalar_lea.vmem [#allocation5], %s692_s10  ;;  %s1073_s12 = scalar_lea.vmem [#allocation6], %s692_s10 }
  0x25   : > { %s311_s27 = scalar_select %p310_p4, %s918_s18, 1 }
  0x26   : > { %s697_s13 = sshll.u32 %s918_s18, 1  ;;  %s531_s26 = sshll.u32 %s294_s11, 4  ;;  %s532_s26 = int_to_ptr.vmem [resolvable:$true] %s531_s26 }
  0x27   : > { %s694_s6 = sshll.u32 %s311_s27, 1  ;;  %s529_s24 = scalar_lea.hbm %s1152_s3, %s697_s13 }
  0x28   : > { %s316_s9 = scalar_lea.vmem %s1150_s1, %s694_s6  ;;  %s533_s25 = sshll.u32 %s529_s24, 4  ;;  %s534_s25 = int_to_ptr.hbm [resolvable:$true] %s533_s25 }
  0x29   : > { %v334_v41 = vld [vmem:[%s316_s9] sm:$0x3]  ;;  %s513_s5 = scalar_lea.sflag [#allocation4], %s1029_s21  ;;  %s826_s27 = sshra.s32 %s534_s25, 4  ;;  %s827_s27 = int_to_ptr.hbm [resolvable:$true] %s826_s27 }
  0x2a   : > { %v338_v3 = vld.sshfl [vmem:[#allocation1 + $0x8] sm:$0xff pattern:$0x75316420]  ;;  %v337_v5 = vld.sshfl [vmem:[#allocation1] sm:$0xff pattern:$0x75316420]  ;;  %p833_p8 = scmp.lt.s32.totalorder %s827_s27, %s1152_s3 }
  0x2b   : > { %v349_v4 = vsel %vm341_vm0, %v338_v3, -inf  ;;  %v342_v7 = vsel %vm341_vm0, %v337_v5, -inf  ;;  %v387_v43 = vperm.slane %v334_v41, 1  ;;  %v386_v44 = vperm.slane %v334_v41, 0  ;;  %s828_s6 = scalar_lea.hbm %s827_s27, 2  ;;  %s832_s9 = scalar_lea.hbm %s1152_s3, 4 }
  0x2c   : > { %v350_v6 = vrot.slane %v349_v4, 4  ;;  %v343_v8 = vrot.slane %v342_v7, 4  ;;  %p829_p5 = scmp.ne.s32.totalorder %s827_s27, %s828_s6  ;;  %p834_p10 = scmp.lt.s32.totalorder %s832_s9, %s828_s6 }
  0x2d   : > { %vm1051_vm1 = vcmp.eq.s32.totalorder %v385_v38, %v387_v43  ;;  %vm1057_vm2 = vcmp.eq.s32.totalorder %v385_v38, %v386_v44 }
  0x2e   : > { %v351_v9 = vmax.f32 %v349_v4, %v350_v6  ;;  %v344_v10 = vmax.f32 %v342_v7, %v343_v8  ;;  %p830_p6 = pnand %p829_p5, %p1006_p9  ;;  %p835_p13 = por %p834_p10, %p833_p8 }
  0x30   : > { %v352_v11 = vrot.slane %v351_v9, 2  ;;  %v345_v12 = vrot.slane %v344_v10, 2  ;;  %p831_p7 = pneg %p830_p6 }
  0x32   : > { %v353_v13 = vmax.f32 %v351_v9, %v352_v11  ;;  %v346_v14 = vmax.f32 %v344_v10, %v345_v12  ;;  %p836_p0 = pnand %p835_p13, %p831_p7 }
  0x34   : > { %v354_v15 = vrot.slane %v353_v13, 1  ;;  %v347_v16 = vrot.slane %v346_v14, 1 }
  0x36   : > { %v355_v17 = vmax.f32 %v353_v13, %v354_v15  ;;  %v348_v18 = vmax.f32 %v346_v14, %v347_v16 }
  0x38   : > { %v358_v19 = vrot.slane %v355_v17, 4 }
  0x3a   : > { %v359_v20 = vsel %vm341_vm0, %v348_v18, %v358_v19 }
  0x3b   : > { %v361_v21 = vsub.f32 %v333_v2, %v359_v20 }
  0x3d   : > { %v362_v22 = vmul.f32 1.442695, %v361_v21 }
  0x3f   : > { %772 = vpow2.f32 %v362_v22 }
  0x45   : > { %v773_v23 = vpop.eup %772 }
  0x46   : > { %365 = vst [vmem:[#allocation1] ss:$2 sm:$0xff] %v773_v23 }
  0x4d   : > { %v367_v24 = vld.sshfl [vmem:[#allocation1 + $0x8] sm:$0xff pattern:$0x75316420]  ;;  %v366_v26 = vld.sshfl [vmem:[#allocation1] sm:$0xff pattern:$0x75316420] }
  0x4e   : > { %v377_v25 = vsel %vm341_vm0, %v367_v24, 0.0  ;;  %v370_v28 = vsel %vm341_vm0, %v366_v26, 0.0  ;;  %390 = vst [vmem:[#allocation1] ss:$2 sm:$0xff] %v773_v23 }
  0x4f   : > { %v378_v27 = vrot.slane %v377_v25, 4  ;;  %v371_v29 = vrot.slane %v370_v28, 4 }
  0x51   : > { %v379_v30 = vadd.f32 %v378_v27, %v377_v25  ;;  %v372_v31 = vadd.f32 %v371_v29, %v370_v28 }
  0x53   : > { %v380_v32 = vrot.slane %v379_v30, 2  ;;  %v373_v34 = vrot.slane %v372_v31, 2 }
  0x55   : > { %v381_v35 = vadd.f32 %v380_v32, %v379_v30  ;;  %v374_v36 = vadd.f32 %v373_v34, %v372_v31  ;;  %v392_v46 = vld.sshfl [vmem:[#allocation1 + $0x8] sm:$0xff pattern:$0x75316420]  ;;  %v391_v49 = vld.sshfl [vmem:[#allocation1] sm:$0xff pattern:$0x75316420] }
  0x56   : > { %v396_v47 = vsel %vm1051_vm1, %v392_v46, 0.0  ;;  %v395_v51 = vsel %vm1057_vm2, %v391_v49, 0.0  ;;  %v929_v30 = vmov 0.0  }
  0x57   : > { %v382_v37 = vrot.slane %v381_v35, 1  ;;  %v375_v39 = vrot.slane %v374_v36, 1  ;;  %v404_v50 = vsel %vm341_vm0, %v396_v47, 0.0  ;;  %v397_v54 = vsel %vm341_vm0, %v395_v51, 0.0  ;;  %331 = vst.msk [vmem:[%s294_s11] sm:$0x3] %vm1067_vm11, %v929_v30 }
  0x58   : > { %v405_v52 = vrot.slane %v404_v50, 4  ;;  %v398_v55 = vrot.slane %v397_v54, 4  ;;  %332 = vst.msk [vmem:[%s1073_s12] sm:$0x3] %vm1067_vm11, %v929_v30 }
  0x59   : > { %v383_v40 = vadd.f32 %v382_v37, %v381_v35  ;;  %v376_v42 = vadd.f32 %v375_v39, %v374_v36 }
  0x5a   : > { %v406_v56 = vadd.f32 %v405_v52, %v404_v50  ;;  %v399_v59 = vadd.f32 %v398_v55, %v397_v54 }
  0x5b   : > { %774 = vrcp.f32 %v383_v40  ;;  %v437_v3 = vand.u32 2147483648, %v383_v40  ;;  %v422_v8 = vand.u32 2147483648, %v376_v42  ;;  %vm431_vm3 = vweird.f32 %v383_v40 }
  0x5c   : > { %776 = vrcp.f32 %v376_v42  ;;  %v407_v60 = vrot.slane %v406_v56, 2  ;;  %v400_v63 = vrot.slane %v399_v59, 2  ;;  %v435_v9 = vand.u32 2147483647, %v383_v40 }
  0x5d   : > { %vm416_vm5 = vweird.f32 %v376_v42  ;;  %v420_v13 = vand.u32 2147483647, %v376_v42  ;;  %v423_v14 = vor.u32 1.1754944e-38, %v422_v8  ;;  %v438_v17 = vor.u32 1.1754944e-38, %v437_v3 }
  0x5e   : > { %v408_v0 = vadd.f32 %v407_v60, %v406_v56  ;;  %v401_v4 = vadd.f32 %v400_v63, %v399_v59  ;;  %vm436_vm9 = vcmp.eq.f32.partialorder %v435_v9, 8.507059e+37 }
  0x5f   : > { %vm421_vm10 = vcmp.eq.f32.partialorder %v420_v13, 8.507059e+37 }
  0x60   : > { %v409_v5 = vrot.slane %v408_v0, 1  ;;  %v402_v10 = vrot.slane %v401_v4, 1 }
  0x61   : > { %v775_v53 = vpop.eup %774 }
  0x62   : > { %v427_v57 = vmul.f32 %v775_v53, %v383_v40  ;;  %v777_v58 = vpop.eup %776  ;;  %vm432_vm4 = vweird.f32 %v775_v53  ;;  %v410_v11 = vadd.f32 %v409_v5, %v408_v0  ;;  %v403_v16 = vadd.f32 %v402_v10, %v401_v4  ;;  %v487_v40 = vld [vmem:[%s294_s11] sm:$0x3] }
  0x63   : > { %v412_v61 = vmul.f32 %v777_v58, %v376_v42  ;;  %vm433_vm6 = vmor %vm431_vm3, %vm432_vm4  ;;  %vm417_vm7 = vweird.f32 %v777_v58 }
  0x64   : > { %v428_v62 = vsub.f32 1.0, %v427_v57  ;;  %vm418_vm8 = vmor %vm416_vm5, %vm417_vm7 }
  0x65   : > { %v413_v1 = vsub.f32 1.0, %v412_v61 }
  0x66   : > { %v429_v2 = vmul.f32 %v775_v53, %v428_v62 }
  0x67   : > { %v414_v6 = vmul.f32 %v777_v58, %v413_v1 }
  0x68   : > { %v430_v7 = vadd.f32 %v775_v53, %v429_v2 }
  0x69   : > { %v415_v12 = vadd.f32 %v777_v58, %v414_v6 }
  0x6a   : > { %v434_v15 = vsel %vm433_vm6, %v775_v53, %v430_v7 }
  0x6b   : > { %v419_v18 = vsel %vm418_vm8, %v777_v58, %v415_v12  ;;  %v439_v20 = vsel %vm436_vm9, %v438_v17, %v434_v15 }
  0x6c   : > { %v424_v19 = vsel %vm421_vm10, %v423_v14, %v419_v18  ;;  %v440_v22 = vmul.f32 %v439_v20, %v410_v11 }
  0x6d   : > { %v425_v21 = vmul.f32 %v424_v19, %v403_v16 }
  0x6e   : > { %v442_v24 = vadd.f32 1e-10, %v440_v22 }
  0x6f   : > { %v441_v23 = vadd.f32 1e-10, %v425_v21 }
  0x70   : > { %v448_v27 = vsub.f32 1.0, %v442_v24 }
  0x71   : > { %778 = vlog2.f32 %v441_v23  ;;  %v447_v26 = vsub.f32 1.0, %v441_v23 }
  0x72   : > { %780 = vlog2.f32 %v442_v24  ;;  %v450_v29 = vmul.f32 %v448_v27, %v448_v27 }
  0x73   : > { %v449_v28 = vmul.f32 %v447_v26, %v447_v26 }
  0x74   : > { %v452_v33 = vsub.f32 0.0, %v450_v29 }
  0x75   : > { %v451_v32 = vsub.f32 0.0, %v449_v28 }
  0x77   : > { %v779_v31 = vpop.eup %778 }
  0x78   : > { %v781_v34 = vpop.eup %780  ;;  %v444_v35 = vmul.f32 0.6931472, %v779_v31 }
  0x79   : > { %v446_v36 = vmul.f32 0.6931472, %v781_v34 }
  0x7a   : > { %v453_v37 = vmul.f32 %v451_v32, %v444_v35 }
  0x7b   : > { %v454_v38 = vmul.f32 %v452_v33, %v446_v36 }
  0x7d   : > { %v492_v39 = vrot.slane %v454_v38, 7 }
  0x7f   : > { %v494_v41 = vsel %vm493_vm12, %v453_v37, %v492_v39 }
  0x80   : > { %v496_v42 = vadd.f32 %v494_v41, %v487_v40 }
  0x82   : > { %501 = vst.msk [vmem:[%s294_s11] sm:$0x3] %vm1067_vm11, %v496_v42 }
  0x83   : > { %839 = shalt.err (!%p836_p0)
}
  0x84   : > { %704 = dma.vmem_to_hbm [thread:$0]  (%p1006_p9), %s532_s26, 32, %s534_s25, %s513_s5   ;;  %v502_v61 = vld [vmem:[%s1073_s12] sm:$0x3] }
  0x85   : > { %s544_s24 = scalar_lea.hbm %s1153_s4, %s697_s13  ;;  %s546_s26 = sshll.u32 %s1073_s12, 4  ;;  %s547_s26 = int_to_ptr.vmem [resolvable:$true] %s546_s26 }
  0x86   : > { %s548_s25 = sshll.u32 %s544_s24, 4  ;;  %s518_s18 = scalar_lea.sflag [#allocation7], %s1029_s21  ;;  %s549_s25 = int_to_ptr.hbm [resolvable:$true] %s548_s25 }
  0x87   : > { %s854_s5 = sshra.s32 %s549_s25, 4  ;;  %s860_s7 = scalar_lea.hbm %s1153_s4, 4  ;;  %s855_s5 = int_to_ptr.hbm [resolvable:$true] %s854_s5 }
  0x88   : > { %s856_s27 = scalar_lea.hbm %s855_s5, 2  ;;  %p861_p4 = scmp.lt.s32.totalorder %s855_s5, %s1153_s4 }
  0x89   : > { %p857_p1 = scmp.ne.s32.totalorder %s855_s5, %s856_s27  ;;  %p862_p5 = scmp.lt.s32.totalorder %s860_s7, %s856_s27 }
  0x8b   : > { %p858_p2 = pnand %p857_p1, %p1006_p9  ;;  %p863_p6 = por %p862_p5, %p861_p4 }
  0x8d   : > { %p859_p3 = pneg %p858_p2 }
  0x8f   : > { %p864_p7 = pnand %p863_p6, %p859_p3 }
  0x96   : > { %v459_v43 = vpop.permute.xlu0 %458 }
  0x97   : > { %v461_v44 = vsel %vm1057_vm2, %v459_v43, 0.0  ;;  %v462_v46 = vsel %vm1051_vm1, %v459_v43, 0.0 }
  0x98   : > { %v463_v47 = vsel %vm341_vm0, %v461_v44, 0.0  ;;  %v470_v49 = vsel %vm341_vm0, %v462_v46, 0.0 }
  0x99   : > { %v464_v50 = vrot.slane %v463_v47, 4  ;;  %v471_v51 = vrot.slane %v470_v49, 4 }
  0x9b   : > { %v465_v52 = vadd.f32 %v464_v50, %v463_v47  ;;  %v472_v53 = vadd.f32 %v471_v51, %v470_v49 }
  0x9d   : > { %v466_v54 = vrot.slane %v465_v52, 2  ;;  %v473_v55 = vrot.slane %v472_v53, 2 }
  0x9f   : > { %v467_v56 = vadd.f32 %v466_v54, %v465_v52  ;;  %v474_v48 = vadd.f32 %v473_v55, %v472_v53 }
  0xa1   : > { %v468_v57 = vrot.slane %v467_v56, 1  ;;  %v475_v58 = vrot.slane %v474_v48, 1 }
  0xa3   : > { %v476_v45 = vadd.f32 %v475_v58, %v474_v48  ;;  %v469_v59 = vadd.f32 %v468_v57, %v467_v56 }
  0xa5   : > { %v507_v60 = vrot.slane %v476_v45, 7 }
  0xa7   : > { %v508_v62 = vsel %vm493_vm12, %v469_v59, %v507_v60 }
  0xa8   : > { %v510_v63 = vadd.f32 %v508_v62, %v502_v61 }
  0xaa   : > { %511 = vst.msk [vmem:[%s1073_s12] sm:$0x3] %vm1067_vm11, %v510_v63 }
  0xab   : > { %867 = shalt.err (!%p864_p7)
}
  0xac   : > { %705 = dma.vmem_to_hbm [thread:$0]  (%p1006_p9), %s547_s26, 32, %s549_s25, %s518_s18  }
  0xad PF: > { %s560_s21 = sand.u32 1, %s906_s15   ;;  %p713_p8 = pnand %p686_p12, %p1013_p11 }
  0xae   : > { %s561_s12 = scalar_lea.sflag [#allocation4], %s560_s21 }
  0xaf   : > { %p714_p10 = pneg %p713_p8 }
  0xb1   : > { %897 = dma.done.wait (%p714_p10), %s561_s12, 32  }
  0xb2   : > { %899 = vsyncadd (%p714_p10), %s561_s12, 4294967264  ;;  %s571_s10 = scalar_lea.sflag [#allocation7], %s560_s21 }
  0xb3   : > { %901 = dma.done.wait (%p714_p10), %s571_s10, 32  }
  0xb4   : > { %903 = vsyncadd (%p714_p10), %s571_s10, 4294967264  ;;  %s24_s20 = sadd.s32 1, %s926_s20   ;;  %s1164_s15 = smov %s910_s16 }
  0xb5   : > { %p21_p13 = scmp.ge.s32.totalorder %s24_s20, 4   ;;  %s1165_s16 = smov %s914_s17 }
  0xb6   : > { %s1166_s17 = smov %s1011_s29  ;;  %s1167_s18 = smov %s922_s19 }
  0xb7   : > { %s1168_s19 = smov %s1170_s23  ;;  %23 = sbr.rel (!%p21_p13) target bundleno = 8 (0x8), region = 101 }
  0xbc   :  { %577 = vsyncpa [#allocation3], 1 }
  0xbd   :  { %579 = vsyncpa [#allocation3 + $0x1], 1 }
  0xbe   :  { %580 = vsyncpa [#allocation4], 1 }
  0xbf   :  { %582 = vsyncpa [#allocation4 + $0x1], 1 }
  0xc0   :  { %583 = vsyncpa [#allocation7], 1 }
  0xc1   :  { %585 = vsyncpa [#allocation7 + $0x1], 1 }

</bundles_post_ra>
